<compile_context>
chip_gen: v5e
topology: v5e:2x2
jax: 0.10.0
libtpu: 0.0.40
codegen_flags: <defaults>
</compile_context>

<pallas_src>
import jax
import jax.numpy as jnp
from jax.experimental import pallas as pl
from jax.experimental.pallas import tpu as pltpu


# ---------------------------------------------------------------------------
# Scalar forward: exactly Module.forward().  Pure scalar ALU work in SMEM.
# ---------------------------------------------------------------------------
def _rosenbrock_scalar_kernel(theta_ref, out_ref):
    # theta_ref: SMEM (2,) f32, out_ref: SMEM (1,) f32
    x = theta_ref[0]
    y = theta_ref[1]
    one_minus_x = 1.0 - x
    resid = y - x * x
    out_ref[0] = one_minus_x * one_minus_x + 100.0 * resid * resid


def rosenbrock_loss(theta: jax.Array) -> jax.Array:
    """theta: (2,) f32 -> (1,) f32 Rosenbrock loss (unconstrained, as in forward())."""
    return pl.pallas_call(
        _rosenbrock_scalar_kernel,
        out_shape=jax.ShapeDtypeStruct((1,), jnp.float32),
        in_specs=[pl.BlockSpec(memory_space=pltpu.SMEM)],
        out_specs=pl.BlockSpec(memory_space=pltpu.SMEM),
    )(theta.astype(jnp.float32))


# ---------------------------------------------------------------------------
# Lane-dense, grid-tiled batched forward: evaluates many (x, y) candidates per
# launch.  Input is a single fused (2, R, 128) array (xs = [0], ys = [1]);
# output is (R, 128) f32.  R must be a multiple of 8 (whole f32 vregs).
# Tiling: (2, TR, 128) / (TR, 128) blocks, double-buffered by the Pallas
# pipeline, row axis marked "parallel" so v7x shards it across both cores.
# ---------------------------------------------------------------------------
def _rosenbrock_batched_kernel(xy_ref, out_ref):
    # xy_ref: VMEM (2, TR, 128); out_ref: VMEM (TR, 128) f32
    x = xy_ref[0].astype(jnp.float32)   # no-op for f32 inputs, upcast for bf16
    y = xy_ref[1].astype(jnp.float32)
    one_minus_x = 1.0 - x
    resid = y - x * x
    out_ref[...] = one_minus_x * one_minus_x + 100.0 * resid * resid


def rosenbrock_loss_batched(xy: jax.Array, *, tr: int | None = None) -> jax.Array:
    """xy: (2, R, 128) f32/bf16 candidates (xy[0]=x, xy[1]=y) -> (R, 128) f32 losses."""
    assert xy.ndim == 3 and xy.shape[0] == 2 and xy.shape[2] == 128, (
        "expected fused (2, R, 128) candidates")
    R = xy.shape[1]
    assert R % 8 == 0, "use whole f32 vregs (R multiple of 8)"
    if tr is None:
        # Largest row-tile <= 1024 that divides R: 512 KiB f32 block; total
        # live VMEM (in + out, double-buffered) ~3 MiB -> fits every TPU gen.
        tr = next(t for t in (1024, 512, 256, 128, 64, 32, 16, 8) if R % t == 0)
    assert R % tr == 0 and tr % 8 == 0, f"tr={tr} must divide R={R} and be a multiple of 8"

    return pl.pallas_call(
        _rosenbrock_batched_kernel,
        out_shape=jax.ShapeDtypeStruct((R, 128), jnp.float32),
        grid=(R // tr,),
        in_specs=[pl.BlockSpec((2, tr, 128), lambda i: (0, i, 0))],
        out_specs=pl.BlockSpec((tr, 128), lambda i: (i, 0)),
        compiler_params=pltpu.CompilerParams(
            dimension_semantics=("parallel",)),
    )(xy)


if __name__ == "__main__":
    key = jax.random.PRNGKey(0)
    k_theta, k_batch = jax.random.split(key)

    # Deterministic parameter init, matching __init__: Uniform(-2, 2), shape (2,)
    theta = jax.random.uniform(
        k_theta, (2,), dtype=jnp.float32, minval=-2.0, maxval=2.0
    )

    # --- scalar forward (the module's forward pass) -------------------------
    loss = rosenbrock_loss(theta)
    jax.block_until_ready(loss)

    x, y = theta[0], theta[1]
    ref = (1.0 - x) ** 2 + 100.0 * (y - x * x) ** 2
    assert jnp.allclose(loss[0], ref, rtol=1e-5, atol=1e-5), (loss, ref)

    # --- batched, grid-tiled forward (small shapes; grid of 4 tiles) --------
    R = 32  # 32 * 128 = 4096 candidates; tr=8 below forces a 4-step grid
    xy = jax.random.uniform(
        k_batch, (2, R, 128), dtype=jnp.float32, minval=-2.0, maxval=2.0
    )
    # Put the module's theta at position [:, 0, 0] so we can cross-check paths.
    xy = xy.at[0, 0, 0].set(theta[0]).at[1, 0, 0].set(theta[1])

    batched = rosenbrock_loss_batched(xy, tr=8)
    jax.block_until_ready(batched)

    xs, ys = xy[0], xy[1]
    batched_ref = (1.0 - xs) ** 2 + 100.0 * (ys - xs * xs) ** 2
    assert jnp.allclose(batched, batched_ref, rtol=1e-5, atol=1e-5)
    assert jnp.allclose(batched[0, 0], loss[0], rtol=1e-5, atol=1e-5)

    print("KERNEL_OK")
</pallas_src>

<mosaic_0001>
module attributes {stable_mosaic.version = 11 : i64} {
  func.func @_rosenbrock_scalar_kernel(%arg0: memref<2xf32, #tpu.memory_space<smem>>, %arg1: memref<1xf32, #tpu.memory_space<smem>>) attributes {dimension_semantics = [], scalar_prefetch = 0 : i64, scratch_operands = 0 : i64, tpu.core_type = #tpu.core_type<tc>} {
    %c0 = arith.constant 0 : index
    %0 = memref.load %arg0[%c0] : memref<2xf32, #tpu.memory_space<smem>>
    %c1 = arith.constant 1 : index
    %1 = memref.load %arg0[%c1] : memref<2xf32, #tpu.memory_space<smem>>
    %cst = arith.constant 1.000000e+00 : f32
    %2 = arith.subf %cst, %0 : f32
    %3 = arith.mulf %0, %0 : f32
    %4 = arith.subf %1, %3 : f32
    %5 = arith.mulf %2, %2 : f32
    %cst_0 = arith.constant 1.000000e+02 : f32
    %6 = arith.mulf %cst_0, %4 : f32
    %7 = arith.mulf %6, %4 : f32
    %8 = arith.addf %5, %7 : f32
    %c0_1 = arith.constant 0 : index
    %9 = memref.load %arg1[%c0_1] : memref<1xf32, #tpu.memory_space<smem>>
    memref.store %8, %arg1[%c0_1] : memref<1xf32, #tpu.memory_space<smem>>
    return
  }
}

</mosaic_0001>

<bundles_post_ra>
// kernel: tpu_custom_call.1
= control target key start
LH: loop header
LB: loop body
LE: loop exit
PB: predicated region body
PF: predicated region fallthrough
CT: control target
= control target key end

     0   :  { %6 = vsyncpa [#allocation3], 0  ;;  %s98_s0 = inlined_call_operand.hbm [shape: f32[2], index: 0, kind: input, shape index: {}]   ;;  %s99_s1 = inlined_call_operand.hbm [shape: f32[1], index: 1, kind: output, shape index: {}]  }
   0x1   :  { %7 = vsyncpa [#allocation4], 0  ;;  %s13_s8 = sshll.u32 %s98_s0, 4  ;;  %s80_s9 = smov [#allocation2]   ;;  %s14_s8 = int_to_ptr.hbm [resolvable:$true] %s13_s8 }
   0x2   :  { %16 = dma.hbm_to_smem %s14_s8, 16, %s80_s9, [#allocation3]  }
   0x3   :  { %76 = dma.done.wait [#allocation3], 16  }
   0x4   :  { %77 = vsyncadd [#allocation3], 4294967280 }
   0x5   :  { %21 = sfence }
   0x6   :  { %s22_s10 = sld [smem:[#allocation2]]  ;;  %s38_s19 = sshll.u32 %s99_s1, 4  ;;  %s39_s19 = int_to_ptr.hbm [resolvable:$true] %s38_s19 }
   0x7   :  { %s49_s11 = sld [smem:[#allocation2 + $0x1]]  ;;  %s81_s21 = smov [#allocation5]  }
   0xc   :  { %s24_s12 = ssub.f32 1.0, %s22_s10  ;;  %s25_s13 = smul.f32 %s22_s10, %s22_s10 }
   0xe   :  { %s26_s14 = ssub.f32 %s49_s11, %s25_s13  ;;  %s27_s15 = smul.f32 %s24_s12, %s24_s12 }
  0x10   :  { %s28_s16 = smul.f32 100.0, %s26_s14 }
  0x12   :  { %s29_s20 = smul.f32 %s28_s16, %s26_s14 }
  0x14   :  { %s30_s0 = sadd.f32 %s29_s20, %s27_s15 }
  0x16   :  { %32 = sst [smem:[#allocation5]] %s30_s0 }
  0x17   :  { %41 = dma.smem_to_hbm %s81_s21, 16, %s39_s19, [#allocation4]  }
  0x18   :  { %78 = dma.done.wait [#allocation4], 16  }
  0x19   :  { %79 = vsyncadd [#allocation4], 4294967280 }
  0x1a   :  { %46 = sfence }
  0x1b   :  { %47 = vsyncpa [#allocation3], 1 }
  0x1c   :  { %48 = vsyncpa [#allocation4], 1 }

</bundles_post_ra>
